<compile_context>
chip_gen: v6e
topology: v6e:2x2x1
jax: 0.10.0
libtpu: 0.0.40
codegen_flags: <defaults>
</compile_context>

<pallas_src>
import functools

import jax
import jax.numpy as jnp
from jax.experimental import pallas as pl
from jax.experimental.pallas import tpu as pltpu

BN_EPS = 1e-5


def dsconv_kernel(x_ref, dwt_ref, msk_ref, g1_ref, b1_ref,
                  pwb_ref, g2_ref, b2_ref, o_ref, *, n, h, w):
    wp = w + 2                      # per-image-row lane pitch (1 zero col each side)
    l_out = h * wp                  # output lanes per (n, c) row (2 slack lanes/row)
    inv_cnt = 1.0 / float(n * h * w)  # BN stat count: N*H*W valid pixels per channel

    xp = x_ref[...]                 # (N*Cin, L_in): padded input, loaded ONCE
    msk = msk_ref[...]              # (1, l_out): 1.0 on valid pixels, 0.0 on slack lanes

    # ---- depthwise 3x3: 9 statically shifted windows of the padded tile ------
    # The wrapper-side zero pad handles every border -> no per-tap masks; the
    # center tap initialises the accumulator (no zeros + add).
    acc = xp[:, wp + 1: wp + 1 + l_out] * dwt_ref[4]
    for kh in range(3):
        for kw in range(3):
            if kh == 1 and kw == 1:
                continue
            off = kh * wp + kw
            acc = acc + xp[:, off: off + l_out] * dwt_ref[kh * 3 + kw]

    # ---- training-mode BatchNorm (+ReLU) --------------------------------------
    # Reduce over lanes first, then fold the batch rows of each channel with
    # exact f32 sublane rolls (VPU/XLU only, no MXU, no precision concerns).
    def batch_fold(v):
        # v: (rows, 1) per-row lane reductions, rows ordered as (batch, channel).
        # Returns per-channel totals broadcast back onto every row.
        c = v.shape[0] // n
        tot = v
        for i in range(1, n):
            tot = tot + pltpu.roll(v, shift=i * c, axis=0)
        return tot

    def bn_relu(y, g_ref, b_ref):
        ym = y * msk                                               # zero slack lanes
        mean = batch_fold(jnp.sum(ym, axis=1, keepdims=True)) * inv_cnt
        d = (y - mean) * msk                                       # centered, slack-zeroed
        var = batch_fold(jnp.sum(d * d, axis=1, keepdims=True)) * inv_cnt
        scale = g_ref[...] * jax.lax.rsqrt(var + BN_EPS)
        return jnp.maximum(d * scale + b_ref[...], 0.0)

    h1 = bn_relu(acc, g1_ref, b1_ref)                              # (N*Cin, l_out)

    # ---- pointwise 1x1 conv as ONE MXU matmul: blockdiag(pw^T) @ h1 -----------
    # TODO(synk): when gridded over batch this becomes a plain (Cout,Cin) matmul
    # shared across grid steps (drops the kron's N^2 zeros).
    y2 = jnp.dot(pwb_ref[...], h1, preferred_element_type=jnp.float32)

    o_ref[...] = bn_relu(y2, g2_ref, b2_ref)                       # (N*Cout, l_out)


@jax.jit
def depthwise_separable_conv(x_nchw, params):
    x = x_nchw.astype(jnp.float32)
    n, cin, h, w = x.shape
    cout = params["pw_w"].shape[1]
    wp = w + 2
    l_out = h * wp
    # lanes needed = output lanes + max tap reach; round up to a 128 multiple
    l_in = ((l_out + 2 * wp + 2 + 127) // 128) * 128

    # Wrapper-side zero pad: rows = (n, c) pairs, lanes = flattened padded image.
    xpad = jnp.pad(x, ((0, 0), (0, 0), (1, 1), (1, 1)))            # (N,Cin,H+2,W+2)
    x2 = xpad.reshape(n * cin, (h + 2) * wp)
    x2 = jnp.pad(x2, ((0, 0), (0, l_in - (h + 2) * wp)))           # (N*Cin, l_in)

    # per-row depthwise tap weights: row r = n*Cin + c  ->  channel c = r % Cin
    dwt = jnp.tile(params["dw_w"].astype(jnp.float32).reshape(9, cin),
                   (1, n)).reshape(9, n * cin, 1)

    # valid-lane mask: pad columns w and w+1 of each image row are slack lanes
    wi = jnp.arange(l_out, dtype=jnp.int32) % wp
    msk = (wi < w).astype(jnp.float32).reshape(1, l_out)

    # block-diagonal pointwise weight: (N*Cout, N*Cin) = kron(I_N, pw^T)
    pwb = jnp.kron(jnp.eye(n, dtype=jnp.float32),
                   params["pw_w"].astype(jnp.float32).T)

    g1 = jnp.tile(params["g1"].astype(jnp.float32), n).reshape(n * cin, 1)
    b1 = jnp.tile(params["b1"].astype(jnp.float32), n).reshape(n * cin, 1)
    g2 = jnp.tile(params["g2"].astype(jnp.float32), n).reshape(n * cout, 1)
    b2 = jnp.tile(params["b2"].astype(jnp.float32), n).reshape(n * cout, 1)

    kernel = functools.partial(dsconv_kernel, n=n, h=h, w=w)

    # TODO(synk): for production-size activations, grid over batch and H-tiles
    # (1-row halo), keep weights VMEM-resident via constant index_maps, split BN
    # into accumulate + normalize passes over an "arbitrary" reduction axis,
    # drop the kron block-diagonal pointwise, mark batch/H axes "parallel"
    # (v7x megacore) and set vmem_limit_bytes for the 64 MiB v7x budget.
    out2 = pl.pallas_call(
        kernel,
        out_shape=jax.ShapeDtypeStruct((n * cout, l_out), jnp.float32),
        in_specs=[pl.BlockSpec(memory_space=pltpu.MemorySpace.VMEM)] * 8,
        out_specs=pl.BlockSpec(memory_space=pltpu.MemorySpace.VMEM),
    )(x2, dwt, msk, g1, b1, pwb, g2, b2)

    # rows are already (n, cout)-ordered; drop the two slack columns per row.
    return out2.reshape(n, cout, h, wp)[:, :, :, :w]


# ---------------- pure-JAX reference (for a correctness check) ----------------
def _ref_bn_relu_nchw(x, gamma, beta):
    mean = jnp.mean(x, axis=(0, 2, 3), keepdims=True)
    var = jnp.mean((x - mean) ** 2, axis=(0, 2, 3), keepdims=True)
    xh = (x - mean) * jax.lax.rsqrt(var + BN_EPS)
    return jnp.maximum(xh * gamma.reshape(1, -1, 1, 1) + beta.reshape(1, -1, 1, 1), 0.0)


def ref_forward(x_nchw, params):
    cin = x_nchw.shape[1]
    dw = jnp.transpose(params["dw_w"], (2, 0, 1))[:, None, :, :]      # (Cin,1,3,3)
    y = jax.lax.conv_general_dilated(
        x_nchw, dw, window_strides=(1, 1), padding=((1, 1), (1, 1)),
        feature_group_count=cin, dimension_numbers=("NCHW", "OIHW", "NCHW"))
    y = _ref_bn_relu_nchw(y, params["g1"], params["b1"])
    pw = jnp.transpose(params["pw_w"], (1, 0))[:, :, None, None]      # (Cout,Cin,1,1)
    z = jax.lax.conv_general_dilated(
        y, pw, window_strides=(1, 1), padding=((0, 0), (0, 0)),
        dimension_numbers=("NCHW", "OIHW", "NCHW"))
    return _ref_bn_relu_nchw(z, params["g2"], params["b2"])


if __name__ == "__main__":
    key = jax.random.PRNGKey(0)
    ks = jax.random.split(key, 6)
    N, Cin, Cout, H, W = 2, 4, 8, 16, 16

    x = jax.random.normal(ks[0], (N, Cin, H, W), jnp.float32)
    params = {
        "dw_w": 0.3 * jax.random.normal(ks[1], (3, 3, Cin), jnp.float32),
        "pw_w": 0.3 * jax.random.normal(ks[2], (Cin, Cout), jnp.float32),
        "g1": 1.0 + 0.1 * jax.random.normal(ks[3], (Cin,), jnp.float32),
        "b1": 0.1 * jax.random.normal(ks[4], (Cin,), jnp.float32),
        "g2": 1.0 + 0.1 * jax.random.normal(ks[5], (Cout,), jnp.float32),
        "b2": jnp.zeros((Cout,), jnp.float32),
    }

    out = jax.block_until_ready(depthwise_separable_conv(x, params))
    assert out.shape == (N, Cout, H, W), out.shape

    ref = jax.block_until_ready(ref_forward(x, params))
    max_err = float(jnp.max(jnp.abs(out - ref)))
    assert max_err < 1e-4, f"mismatch vs reference: {max_err}"

    print("KERNEL_OK")
</pallas_src>

<mosaic_0001>
module attributes {stable_mosaic.version = 11 : i64} {
  func.func @dsconv_kernel(%arg0: memref<8x384xf32, #tpu.memory_space<vmem>>, %arg1: memref<9x8x1xf32, #tpu.memory_space<vmem>>, %arg2: memref<1x288xf32, #tpu.memory_space<vmem>>, %arg3: memref<8x1xf32, #tpu.memory_space<vmem>>, %arg4: memref<8x1xf32, #tpu.memory_space<vmem>>, %arg5: memref<16x8xf32, #tpu.memory_space<vmem>>, %arg6: memref<16x1xf32, #tpu.memory_space<vmem>>, %arg7: memref<16x1xf32, #tpu.memory_space<vmem>>, %arg8: memref<16x288xf32, #tpu.memory_space<vmem>>) attributes {dimension_semantics = [], scalar_prefetch = 0 : i64, scratch_operands = 0 : i64, tpu.core_type = #tpu.core_type<tc>} {
    %c0 = arith.constant 0 : index
    %c0_0 = arith.constant 0 : index
    %0 = vector.load %arg0[%c0, %c0_0] : memref<8x384xf32, #tpu.memory_space<vmem>>, vector<8x384xf32>
    %c0_1 = arith.constant 0 : index
    %c0_2 = arith.constant 0 : index
    %1 = vector.load %arg2[%c0_1, %c0_2] : memref<1x288xf32, #tpu.memory_space<vmem>>, vector<1x288xf32>
    %2 = vector.extract_strided_slice %0 {offsets = [0, 19], sizes = [8, 288], strides = [1, 1]} : vector<8x384xf32> to vector<8x288xf32>
    %c4 = arith.constant 4 : index
    %c0_3 = arith.constant 0 : index
    %c0_4 = arith.constant 0 : index
    %3 = vector.load %arg1[%c4, %c0_3, %c0_4] : memref<9x8x1xf32, #tpu.memory_space<vmem>>, vector<1x8x1xf32>
    %4 = vector.shape_cast %3 : vector<1x8x1xf32> to vector<8x1xf32>
    %5 = vector.broadcast %4 : vector<8x1xf32> to vector<8x288xf32>
    %6 = arith.mulf %2, %5 : vector<8x288xf32>
    %7 = vector.extract_strided_slice %0 {offsets = [0, 0], sizes = [8, 288], strides = [1, 1]} : vector<8x384xf32> to vector<8x288xf32>
    %c0_5 = arith.constant 0 : index
    %c0_6 = arith.constant 0 : index
    %c0_7 = arith.constant 0 : index
    %8 = vector.load %arg1[%c0_5, %c0_6, %c0_7] : memref<9x8x1xf32, #tpu.memory_space<vmem>>, vector<1x8x1xf32>
    %9 = vector.shape_cast %8 : vector<1x8x1xf32> to vector<8x1xf32>
    %10 = vector.broadcast %9 : vector<8x1xf32> to vector<8x288xf32>
    %11 = arith.mulf %7, %10 : vector<8x288xf32>
    %12 = arith.addf %6, %11 : vector<8x288xf32>
    %13 = vector.extract_strided_slice %0 {offsets = [0, 1], sizes = [8, 288], strides = [1, 1]} : vector<8x384xf32> to vector<8x288xf32>
    %c1 = arith.constant 1 : index
    %c0_8 = arith.constant 0 : index
    %c0_9 = arith.constant 0 : index
    %14 = vector.load %arg1[%c1, %c0_8, %c0_9] : memref<9x8x1xf32, #tpu.memory_space<vmem>>, vector<1x8x1xf32>
    %15 = vector.shape_cast %14 : vector<1x8x1xf32> to vector<8x1xf32>
    %16 = vector.broadcast %15 : vector<8x1xf32> to vector<8x288xf32>
    %17 = arith.mulf %13, %16 : vector<8x288xf32>
    %18 = arith.addf %12, %17 : vector<8x288xf32>
    %19 = vector.extract_strided_slice %0 {offsets = [0, 2], sizes = [8, 288], strides = [1, 1]} : vector<8x384xf32> to vector<8x288xf32>
    %c2 = arith.constant 2 : index
    %c0_10 = arith.constant 0 : index
    %c0_11 = arith.constant 0 : index
    %20 = vector.load %arg1[%c2, %c0_10, %c0_11] : memref<9x8x1xf32, #tpu.memory_space<vmem>>, vector<1x8x1xf32>
    %21 = vector.shape_cast %20 : vector<1x8x1xf32> to vector<8x1xf32>
    %22 = vector.broadcast %21 : vector<8x1xf32> to vector<8x288xf32>
    %23 = arith.mulf %19, %22 : vector<8x288xf32>
    %24 = arith.addf %18, %23 : vector<8x288xf32>
    %25 = vector.extract_strided_slice %0 {offsets = [0, 18], sizes = [8, 288], strides = [1, 1]} : vector<8x384xf32> to vector<8x288xf32>
    %c3 = arith.constant 3 : index
    %c0_12 = arith.constant 0 : index
    %c0_13 = arith.constant 0 : index
    %26 = vector.load %arg1[%c3, %c0_12, %c0_13] : memref<9x8x1xf32, #tpu.memory_space<vmem>>, vector<1x8x1xf32>
    %27 = vector.shape_cast %26 : vector<1x8x1xf32> to vector<8x1xf32>
    %28 = vector.broadcast %27 : vector<8x1xf32> to vector<8x288xf32>
    %29 = arith.mulf %25, %28 : vector<8x288xf32>
    %30 = arith.addf %24, %29 : vector<8x288xf32>
    %31 = vector.extract_strided_slice %0 {offsets = [0, 20], sizes = [8, 288], strides = [1, 1]} : vector<8x384xf32> to vector<8x288xf32>
    %c5 = arith.constant 5 : index
    %c0_14 = arith.constant 0 : index
    %c0_15 = arith.constant 0 : index
    %32 = vector.load %arg1[%c5, %c0_14, %c0_15] : memref<9x8x1xf32, #tpu.memory_space<vmem>>, vector<1x8x1xf32>
    %33 = vector.shape_cast %32 : vector<1x8x1xf32> to vector<8x1xf32>
    %34 = vector.broadcast %33 : vector<8x1xf32> to vector<8x288xf32>
    %35 = arith.mulf %31, %34 : vector<8x288xf32>
    %36 = arith.addf %30, %35 : vector<8x288xf32>
    %37 = vector.extract_strided_slice %0 {offsets = [0, 36], sizes = [8, 288], strides = [1, 1]} : vector<8x384xf32> to vector<8x288xf32>
    %c6 = arith.constant 6 : index
    %c0_16 = arith.constant 0 : index
    %c0_17 = arith.constant 0 : index
    %38 = vector.load %arg1[%c6, %c0_16, %c0_17] : memref<9x8x1xf32, #tpu.memory_space<vmem>>, vector<1x8x1xf32>
    %39 = vector.shape_cast %38 : vector<1x8x1xf32> to vector<8x1xf32>
    %40 = vector.broadcast %39 : vector<8x1xf32> to vector<8x288xf32>
    %41 = arith.mulf %37, %40 : vector<8x288xf32>
    %42 = arith.addf %36, %41 : vector<8x288xf32>
    %43 = vector.extract_strided_slice %0 {offsets = [0, 37], sizes = [8, 288], strides = [1, 1]} : vector<8x384xf32> to vector<8x288xf32>
    %c7 = arith.constant 7 : index
    %c0_18 = arith.constant 0 : index
    %c0_19 = arith.constant 0 : index
    %44 = vector.load %arg1[%c7, %c0_18, %c0_19] : memref<9x8x1xf32, #tpu.memory_space<vmem>>, vector<1x8x1xf32>
    %45 = vector.shape_cast %44 : vector<1x8x1xf32> to vector<8x1xf32>
    %46 = vector.broadcast %45 : vector<8x1xf32> to vector<8x288xf32>
    %47 = arith.mulf %43, %46 : vector<8x288xf32>
    %48 = arith.addf %42, %47 : vector<8x288xf32>
    %49 = vector.extract_strided_slice %0 {offsets = [0, 38], sizes = [8, 288], strides = [1, 1]} : vector<8x384xf32> to vector<8x288xf32>
    %c8 = arith.constant 8 : index
    %c0_20 = arith.constant 0 : index
    %c0_21 = arith.constant 0 : index
    %50 = vector.load %arg1[%c8, %c0_20, %c0_21] : memref<9x8x1xf32, #tpu.memory_space<vmem>>, vector<1x8x1xf32>
    %51 = vector.shape_cast %50 : vector<1x8x1xf32> to vector<8x1xf32>
    %52 = vector.broadcast %51 : vector<8x1xf32> to vector<8x288xf32>
    %53 = arith.mulf %49, %52 : vector<8x288xf32>
    %54 = arith.addf %48, %53 : vector<8x288xf32>
    %55 = vector.broadcast %1 : vector<1x288xf32> to vector<8x288xf32>
    %56 = arith.mulf %54, %55 : vector<8x288xf32>
    %cst = arith.constant dense<0.000000e+00> : vector<8xf32>
    %57 = vector.multi_reduction <add>, %56, %cst [1] : vector<8x288xf32> to vector<8xf32>
    %58 = vector.shape_cast %57 : vector<8xf32> to vector<8x1xf32>
    %c4_i32 = arith.constant 4 : i32
    %59 = tpu.dynamic_rotate %58 by %c4_i32 dim 0 : vector<8x1xf32>, i32 -> vector<8x1xf32>
    %60 = arith.addf %58, %59 : vector<8x1xf32>
    %cst_22 = arith.constant 0.001953125 : f32
    %61 = vector.broadcast %cst_22 : f32 to vector<8x1xf32>
    %62 = arith.mulf %60, %61 : vector<8x1xf32>
    %63 = vector.broadcast %62 : vector<8x1xf32> to vector<8x288xf32>
    %64 = arith.subf %54, %63 : vector<8x288xf32>
    %65 = vector.broadcast %1 : vector<1x288xf32> to vector<8x288xf32>
    %66 = arith.mulf %64, %65 : vector<8x288xf32>
    %67 = arith.mulf %66, %66 : vector<8x288xf32>
    %cst_23 = arith.constant dense<0.000000e+00> : vector<8xf32>
    %68 = vector.multi_reduction <add>, %67, %cst_23 [1] : vector<8x288xf32> to vector<8xf32>
    %69 = vector.shape_cast %68 : vector<8xf32> to vector<8x1xf32>
    %c4_i32_24 = arith.constant 4 : i32
    %70 = tpu.dynamic_rotate %69 by %c4_i32_24 dim 0 : vector<8x1xf32>, i32 -> vector<8x1xf32>
    %71 = arith.addf %69, %70 : vector<8x1xf32>
    %cst_25 = arith.constant 0.001953125 : f32
    %72 = vector.broadcast %cst_25 : f32 to vector<8x1xf32>
    %73 = arith.mulf %71, %72 : vector<8x1xf32>
    %c0_26 = arith.constant 0 : index
    %c0_27 = arith.constant 0 : index
    %74 = vector.load %arg3[%c0_26, %c0_27] : memref<8x1xf32, #tpu.memory_space<vmem>>, vector<8x1xf32>
    %cst_28 = arith.constant 9.99999974E-6 : f32
    %75 = vector.broadcast %cst_28 : f32 to vector<8x1xf32>
    %76 = arith.addf %73, %75 : vector<8x1xf32>
    %77 = math.rsqrt %76 : vector<8x1xf32>
    %78 = arith.mulf %74, %77 : vector<8x1xf32>
    %79 = vector.broadcast %78 : vector<8x1xf32> to vector<8x288xf32>
    %80 = arith.mulf %66, %79 : vector<8x288xf32>
    %c0_29 = arith.constant 0 : index
    %c0_30 = arith.constant 0 : index
    %81 = vector.load %arg4[%c0_29, %c0_30] : memref<8x1xf32, #tpu.memory_space<vmem>>, vector<8x1xf32>
    %82 = vector.broadcast %81 : vector<8x1xf32> to vector<8x288xf32>
    %83 = arith.addf %80, %82 : vector<8x288xf32>
    %cst_31 = arith.constant 0.000000e+00 : f32
    %84 = vector.broadcast %cst_31 : f32 to vector<8x288xf32>
    %85 = arith.maximumf %83, %84 : vector<8x288xf32>
    %c0_32 = arith.constant 0 : index
    %c0_33 = arith.constant 0 : index
    %86 = vector.load %arg5[%c0_32, %c0_33] : memref<16x8xf32, #tpu.memory_space<vmem>>, vector<16x8xf32>
    %cst_34 = arith.constant dense<0.000000e+00> : vector<16x288xf32>
    %87 = tpu.matmul %86, %85, %cst_34 {dimension_numbers = #tpu.dot_dimension_numbers<[1], [0], [0], [1], [0, 0, 1, 1], [], []>} : vector<16x8xf32>, vector<8x288xf32>, vector<16x288xf32> -> vector<16x288xf32>
    %88 = vector.broadcast %1 : vector<1x288xf32> to vector<16x288xf32>
    %89 = arith.mulf %87, %88 : vector<16x288xf32>
    %cst_35 = arith.constant dense<0.000000e+00> : vector<16xf32>
    %90 = vector.multi_reduction <add>, %89, %cst_35 [1] : vector<16x288xf32> to vector<16xf32>
    %91 = vector.shape_cast %90 : vector<16xf32> to vector<16x1xf32>
    %c8_i32 = arith.constant 8 : i32
    %92 = tpu.dynamic_rotate %91 by %c8_i32 dim 0 : vector<16x1xf32>, i32 -> vector<16x1xf32>
    %93 = arith.addf %91, %92 : vector<16x1xf32>
    %cst_36 = arith.constant 0.001953125 : f32
    %94 = vector.broadcast %cst_36 : f32 to vector<16x1xf32>
    %95 = arith.mulf %93, %94 : vector<16x1xf32>
    %96 = vector.broadcast %95 : vector<16x1xf32> to vector<16x288xf32>
    %97 = arith.subf %87, %96 : vector<16x288xf32>
    %98 = vector.broadcast %1 : vector<1x288xf32> to vector<16x288xf32>
    %99 = arith.mulf %97, %98 : vector<16x288xf32>
    %100 = arith.mulf %99, %99 : vector<16x288xf32>
    %cst_37 = arith.constant dense<0.000000e+00> : vector<16xf32>
    %101 = vector.multi_reduction <add>, %100, %cst_37 [1] : vector<16x288xf32> to vector<16xf32>
    %102 = vector.shape_cast %101 : vector<16xf32> to vector<16x1xf32>
    %c8_i32_38 = arith.constant 8 : i32
    %103 = tpu.dynamic_rotate %102 by %c8_i32_38 dim 0 : vector<16x1xf32>, i32 -> vector<16x1xf32>
    %104 = arith.addf %102, %103 : vector<16x1xf32>
    %cst_39 = arith.constant 0.001953125 : f32
    %105 = vector.broadcast %cst_39 : f32 to vector<16x1xf32>
    %106 = arith.mulf %104, %105 : vector<16x1xf32>
    %c0_40 = arith.constant 0 : index
    %c0_41 = arith.constant 0 : index
    %107 = vector.load %arg6[%c0_40, %c0_41] : memref<16x1xf32, #tpu.memory_space<vmem>>, vector<16x1xf32>
    %cst_42 = arith.constant 9.99999974E-6 : f32
    %108 = vector.broadcast %cst_42 : f32 to vector<16x1xf32>
    %109 = arith.addf %106, %108 : vector<16x1xf32>
    %110 = math.rsqrt %109 : vector<16x1xf32>
    %111 = arith.mulf %107, %110 : vector<16x1xf32>
    %112 = vector.broadcast %111 : vector<16x1xf32> to vector<16x288xf32>
    %113 = arith.mulf %99, %112 : vector<16x288xf32>
    %c0_43 = arith.constant 0 : index
    %c0_44 = arith.constant 0 : index
    %114 = vector.load %arg7[%c0_43, %c0_44] : memref<16x1xf32, #tpu.memory_space<vmem>>, vector<16x1xf32>
    %115 = vector.broadcast %114 : vector<16x1xf32> to vector<16x288xf32>
    %116 = arith.addf %113, %115 : vector<16x288xf32>
    %cst_45 = arith.constant 0.000000e+00 : f32
    %117 = vector.broadcast %cst_45 : f32 to vector<16x288xf32>
    %118 = arith.maximumf %116, %117 : vector<16x288xf32>
    %c0_46 = arith.constant 0 : index
    %c0_47 = arith.constant 0 : index
    %119 = vector.load %arg8[%c0_46, %c0_47] : memref<16x288xf32, #tpu.memory_space<vmem>>, vector<16x288xf32>
    tpu.vector_store %arg8[%c0_46, %c0_47], %118 {strides = array<i32>} : memref<16x288xf32, #tpu.memory_space<vmem>>, vector<16x288xf32>,
    return
  }
}

</mosaic_0001>

<bundles_post_ra>
// kernel: tile.41
= control target key start
LH: loop header
LB: loop body
LE: loop exit
PB: predicated region body
PF: predicated region fallthrough
CT: control target
= control target key end

     0   :  { %s22_s0 = inlined_call_operand.vmem [shape: f32[8], index: 0, kind: input, shape index: {}]   ;;  %s23_s1 = inlined_call_operand.vmem [shape: f32[2,8], index: 1, kind: output, shape index: {}]  }
   0x1   :  { %v4_v0 = vld [vmem:[%s22_s0] ss:$0 sm:$0xff] }
   0x2   :  { %5 = vst [vmem:[%s23_s1] sm:$0x3] %v4_v0 }

// kernel: tile.2
= control target key start
LH: loop header
LB: loop body
LE: loop exit
PB: predicated region body
PF: predicated region fallthrough
CT: control target
= control target key end

     0   :  { %s67_s8 = smov 125   ;;  %vm8_vm0 = vcmask 7168   ;;  %s68_s11 = smov 126   ;;  %s118_s0 = inlined_call_operand.vmem [shape: f32[2,8], index: 0, kind: input, shape index: {}]   ;;  %s119_s1 = inlined_call_operand.vmem [shape: f32[16,1], index: 1, kind: output, shape index: {}]  }
   0x1   :  { %v5_v0 = vld [vmem:[%s118_s0] sm:$0x3]  ;;  %s66_s0 = smov 127   ;;  %s69_s12 = smov 124  }
   0x2   :  { %6 = vst [vmem:[#allocation0] sm:$0x3] %v5_v0  ;;  %s70_s13 = smov 123   ;;  %s71_s14 = smov 122  }
   0x3   :  { %s72_s15 = smov 121  }
   0x9   :  { %v10_v1 = vld [vmem:[#allocation0] sm:$0x3]  }
   0xa   :  { %v22_v2 = vld [vmem:[#allocation0] sm:$0x3]   ;;  %11 = vrot.lane.b32.xlu0 %v10_v1, %s66_s0 }
   0xb   :  { %23 = vrot.lane.b32.xlu1 %v22_v2, %s67_s8  ;;  %v16_v3 = vld [vmem:[#allocation0] sm:$0x3]  }
   0xc   :  { %v28_v4 = vld [vmem:[#allocation0] sm:$0x3]  }
   0xd   :  { %v7_v5 = vld [vmem:[#allocation0] sm:$0x3]  }
   0xe   :  { %9 = vst.msk [vmem:[%s119_s1] ss:$8 sm:$0x3] %vm8_vm0, %v7_v5   ;;  %17 = vrot.lane.b32.xlu0 %v16_v3, %s68_s11  ;;  %v34_v6 = vld [vmem:[#allocation0] sm:$0x3]  }
   0xf   :  { %29 = vrot.lane.b32.xlu1 %v28_v4, %s69_s12  ;;  %v40_v7 = vld [vmem:[#allocation0] sm:$0x3]  }
  0x10   :  { %v46_v8 = vld [vmem:[#allocation0] sm:$0x3]  }
  0x12   :  { %35 = vrot.lane.b32.xlu0 %v34_v6, %s70_s13 }
  0x13   :  { %41 = vrot.lane.b32.xlu1 %v40_v7, %s71_s14 }
  0x16   :  { %47 = vrot.lane.b32.xlu0 %v46_v8, %s72_s15 }
  0x7c   :  { %v12_v9 = vpop.permute.xlu0 %11  }
  0x7d   :  { %v24_v10 = vpop.permute.xlu1 %23   ;;  %52 = vst.msk [vmem:[%s119_s1 + $0x1] ss:$8 sm:$0x3] %vm8_vm0, %v12_v9  }
  0x7e   :  { %54 = vst.msk [vmem:[%s119_s1 + $0x3] ss:$8 sm:$0x3] %vm8_vm0, %v24_v10  }
  0x80   :  { %v18_v11 = vpop.permute.xlu0 %17  }
  0x81   :  { %v30_v12 = vpop.permute.xlu1 %29   ;;  %53 = vst.msk [vmem:[%s119_s1 + $0x2] ss:$8 sm:$0x3] %vm8_vm0, %v18_v11  }
  0x82   :  { %55 = vst.msk [vmem:[%s119_s1 + $0x4] ss:$8 sm:$0x3] %vm8_vm0, %v30_v12  }
  0x84   :  { %v36_v13 = vpop.permute.xlu0 %35  }
  0x85   :  { %v42_v14 = vpop.permute.xlu1 %41   ;;  %56 = vst.msk [vmem:[%s119_s1 + $0x5] ss:$8 sm:$0x3] %vm8_vm0, %v36_v13  }
  0x86   :  { %57 = vst.msk [vmem:[%s119_s1 + $0x6] ss:$8 sm:$0x3] %vm8_vm0, %v42_v14  }
  0x88   :  { %v48_v15 = vpop.permute.xlu0 %47  }
  0x89   :  { %58 = vst.msk [vmem:[%s119_s1 + $0x7] ss:$8 sm:$0x3] %vm8_vm0, %v48_v15  }

// kernel: tile.31
= control target key start
LH: loop header
LB: loop body
LE: loop exit
PB: predicated region body
PF: predicated region fallthrough
CT: control target
= control target key end

     0   :  { %s22_s0 = inlined_call_operand.vmem [shape: f32[4], index: 0, kind: input, shape index: {}]   ;;  %s23_s1 = inlined_call_operand.vmem [shape: f32[2,4], index: 1, kind: output, shape index: {}]  }
   0x1   :  { %v4_v0 = vld [vmem:[%s22_s0] ss:$0 sm:$0xff] }
   0x2   :  { %5 = vst [vmem:[%s23_s1] sm:$0x3] %v4_v0 }

// kernel: tile.0
= control target key start
LH: loop header
LB: loop body
LE: loop exit
PB: predicated region body
PF: predicated region fallthrough
CT: control target
= control target key end

     0   :  { %s35_s8 = smov 125   ;;  %vm8_vm0 = vcmask 7168   ;;  %s36_s11 = smov 126   ;;  %s62_s0 = inlined_call_operand.vmem [shape: f32[2,4], index: 0, kind: input, shape index: {}]   ;;  %s63_s1 = inlined_call_operand.vmem [shape: f32[8,1], index: 1, kind: output, shape index: {}]  }
   0x1   :  { %v5_v0 = vld [vmem:[%s62_s0] sm:$0x3]  ;;  %s34_s0 = smov 127  }
   0x2   :  { %6 = vst [vmem:[#allocation0] sm:$0x3] %v5_v0 }
   0x9   :  { %v10_v1 = vld [vmem:[#allocation0] sm:$0x3]  }
   0xa   :  { %v22_v2 = vld [vmem:[#allocation0] sm:$0x3]   ;;  %11 = vrot.lane.b32.xlu0 %v10_v1, %s34_s0 }
   0xb   :  { %23 = vrot.lane.b32.xlu1 %v22_v2, %s35_s8  ;;  %v7_v3 = vld [vmem:[#allocation0] sm:$0x3]  }
   0xc   :  { %v16_v4 = vld [vmem:[#allocation0] sm:$0x3]   ;;  %9 = vst.msk [vmem:[%s63_s1] ss:$4 sm:$0x3] %vm8_vm0, %v7_v3  }
   0xe   :  { %17 = vrot.lane.b32.xlu0 %v16_v4, %s36_s11 }
  0x7c   :  { %v12_v5 = vpop.permute.xlu0 %11  }
  0x7d   :  { %v24_v6 = vpop.permute.xlu1 %23   ;;  %28 = vst.msk [vmem:[%s63_s1 + $0x1] ss:$4 sm:$0x3] %vm8_vm0, %v12_v5  }
  0x7e   :  { %30 = vst.msk [vmem:[%s63_s1 + $0x3] ss:$4 sm:$0x3] %vm8_vm0, %v24_v6  }
  0x80   :  { %v18_v7 = vpop.permute.xlu0 %17  }
  0x81   :  { %29 = vst.msk [vmem:[%s63_s1 + $0x2] ss:$4 sm:$0x3] %vm8_vm0, %v18_v7  }

// kernel: depthwise_separable_conv.1
= control target key start
LH: loop header
LB: loop body
LE: loop exit
PB: predicated region body
PF: predicated region fallthrough
CT: control target
= control target key end

     0   :  { %v699_v0 = vmov 0   ;;  %v267_v3 = vlaneseq  ;;  %s700_s25 = smov 19   ;;  %s701_s30 = smov 18   ;;  %vm61_vm0 = vcmask 154624   ;;  %vm89_vm1 = vcmask 146432   ;;  %s942_s1 = inlined_call_operand.vmem [shape: f32[9,8,1], index: 1, kind: input, shape index: {}]   ;;  %s943_s2 = inlined_call_operand.vmem [shape: f32[1,288], index: 2, kind: input, shape index: {}]   ;;  %s944_s0 = inlined_call_operand.vmem [shape: f32[8,384], index: 0, kind: input, shape index: {}]   ;;  %s945_s4 = inlined_call_operand.vmem [shape: f32[8,1], index: 4, kind: input, shape index: {}]   ;;  %s946_s3 = inlined_call_operand.vmem [shape: f32[8,1], index: 3, kind: input, shape index: {}]   ;;  %s947_s5 = inlined_call_operand.vmem [shape: f32[16,8], index: 5, kind: input, shape index: {}]   ;;  %s948_s7 = inlined_call_operand.vmem [shape: f32[16,1], index: 7, kind: input, shape index: {}]   ;;  %s949_s6 = inlined_call_operand.vmem [shape: f32[16,1], index: 6, kind: input, shape index: {}]   ;;  %s950_s8 = inlined_call_operand.vmem [shape: f32[16,288], index: 8, kind: output, shape index: {}]  }
   0x1   :  { %694 = vset.pattern.permute.xlu1 %v699_v0  ;;  %693 = vset.pattern.permute.xlu0 %v699_v0  ;;  %v665_v1 = vld [vmem:[%s942_s1 + $0x10] sm:$0xff]  ;;  %v43_v2 = vld [vmem:[%s942_s1] sm:$0xff]  ;;  %v666_v4 = vld [vmem:[%s942_s1 + $0x18] sm:$0xff]  ;;  %s703_s9 = smov 1   ;;  %s704_s10 = smov 127   ;;  %vm117_vm2 = vcmask 138240  }
   0x2   :  { %102 = vperm.xlu1 %694, %v665_v1   ;;  %46 = vperm.xlu0 %693, %v43_v2   ;;  %v664_v5 = vld [vmem:[%s942_s1 + $0x8] sm:$0xff]  ;;  %v268_v6 = vshrl.u32 %v267_v3, 7  ;;  %v668_v7 = vld [vmem:[%s942_s1 + $0x30] sm:$0xff]  ;;  %v670_v10 = vld [vmem:[%s942_s1 + $0x40] sm:$0xff]  ;;  %s705_s11 = smov 111   ;;  %s706_s12 = smov 110  }
   0x3   :  { %v667_v8 = vld [vmem:[%s942_s1 + $0x28] sm:$0xff]  ;;  %v669_v11 = vld [vmem:[%s942_s1 + $0x38] sm:$0xff]  ;;  %v32_v12 = vld [vmem:[%s943_s2] sm:$0x7]  ;;  %s707_s13 = smov 109   ;;  %vm173_vm3 = vcmask 1039360  }
   0x4   :  { %v269_v9 = vsub.s32 0, %v268_v6  ;;  %v663_v14 = vld [vmem:[%s942_s1 + $0x20] sm:$0xff]  ;;  %v273_v15 = vsub.s32 1, %v268_v6  ;;  %v277_v16 = vsub.s32 2, %v268_v6  ;;  %v800_v20 = vld [vmem:[%s944_s0 + $0x8] sm:$0xff]  ;;  %v806_v23 = vld [vmem:[%s944_s0 + $0x10] sm:$0xff] }
   0x5   :  { %v795_v19 = vld [vmem:[%s944_s0] sm:$0xff]  ;;  %s702_s0 = smov 17   ;;  %vm145_vm4 = vcmask 7168   ;;  %vm201_vm5 = vcmask 908288   ;;  %vm229_vm6 = vcmask 900096   ;;  %vm257_vm7 = vcmask 891904  }
   0x6   :  { %130 = vperm.xlu1 %694, %v666_v4   ;;  %74 = vperm.xlu0 %693, %v664_v5   ;;  %v781_v13 = vrot.slane %v32_v12, %v269_v9  ;;  %v788_v17 = vrot.slane %v32_v12, %v273_v15  ;;  %v790_v18 = vrot.slane %v32_v12, %v277_v16  ;;  %vm308_vm8 = vcmask 261120  }
   0x7   :  { %vm392_vm9 = vcmask 64512  }
   0xa   :  { %186 = vperm.xlu1 %694, %v668_v7   ;;  %158 = vperm.xlu0 %693, %v667_v8  }
   0xe   :  { %242 = vperm.xlu1 %694, %v670_v10   ;;  %214 = vperm.xlu0 %693, %v669_v11  }
  0x12   :  { %37 = vperm.xlu0 %693, %v663_v14   ;;  %279 = vrot.lane.b32.xlu1 %v781_v13, %s700_s25 }
  0x7d   :  { %v47_v21 = vpop.permute.xlu0 %46  ;;  %v103_v29 = vpop.permute.xlu1 %102 }
  0x7e   :  { %v49_v22 = vmul.f32 %v47_v21, %v795_v19  ;;  %v50_v24 = vmul.f32 %v47_v21, %v800_v20  ;;  %v51_v26 = vmul.f32 %v47_v21, %v806_v23  ;;  %v105_v31 = vmul.f32 %v103_v29, %v795_v19 }
  0x7f   :  { %v106_v32 = vmul.f32 %v103_v29, %v800_v20  ;;  %v107_v33 = vmul.f32 %v103_v29, %v806_v23 }
  0x80   :  { %55 = vrot.lane.b32.xlu1 %v49_v22, %s700_s25  ;;  %57 = vrot.lane.b32.xlu0 %v50_v24, %s700_s25 }
  0x81   :  { %v75_v25 = vpop.permute.xlu0 %74  ;;  %v131_v34 = vpop.permute.xlu1 %130 }
  0x82   :  { %v77_v27 = vmul.f32 %v75_v25, %v795_v19  ;;  %v78_v28 = vmul.f32 %v75_v25, %v800_v20  ;;  %v79_v30 = vmul.f32 %v75_v25, %v806_v23  ;;  %v133_v35 = vmul.f32 %v131_v34, %v795_v19 }
  0x83   :  { %v134_v36 = vmul.f32 %v131_v34, %v800_v20  ;;  %v135_v37 = vmul.f32 %v131_v34, %v806_v23 }
  0x84   :  { %59 = vrot.lane.b32.xlu1 %v51_v26, %s700_s25  ;;  %83 = vrot.lane.b32.xlu0 %v77_v27, %s701_s30 }
  0x85   :  { %v159_v38 = vpop.permute.xlu0 %158  ;;  %v187_v41 = vpop.permute.xlu1 %186 }
  0x86   :  { %v161_v39 = vmul.f32 %v159_v38, %v795_v19  ;;  %v162_v40 = vmul.f32 %v159_v38, %v800_v20  ;;  %v163_v42 = vmul.f32 %v159_v38, %v806_v23  ;;  %v189_v43 = vmul.f32 %v187_v41, %v795_v19 }
  0x87   :  { %v190_v44 = vmul.f32 %v187_v41, %v800_v20  ;;  %v191_v45 = vmul.f32 %v187_v41, %v806_v23 }
  0x88   :  { %85 = vrot.lane.b32.xlu1 %v78_v28, %s701_s30  ;;  %87 = vrot.lane.b32.xlu0 %v79_v30, %s701_s30 }
  0x89   :  { %v215_v46 = vpop.permute.xlu0 %214  ;;  %v243_v49 = vpop.permute.xlu1 %242 }
  0x8a   :  { %v217_v47 = vmul.f32 %v215_v46, %v795_v19  ;;  %v218_v48 = vmul.f32 %v215_v46, %v800_v20  ;;  %v219_v50 = vmul.f32 %v215_v46, %v806_v23  ;;  %v245_v51 = vmul.f32 %v243_v49, %v795_v19 }
  0x8b   :  { %v246_v52 = vmul.f32 %v243_v49, %v800_v20  ;;  %v247_v53 = vmul.f32 %v243_v49, %v806_v23 }
  0x8c   :  { %111 = vrot.lane.b32.xlu1 %v105_v31, %s702_s0  ;;  %113 = vrot.lane.b32.xlu0 %v106_v32, %s702_s0 }
  0x8d   :  { %v841_v54 = vpop.permute.xlu1 %279  ;;  %v38_v55 = vpop.permute.xlu0 %37 }
  0x8e   :  { %v40_v8 = vmul.f32 %v38_v55, %v795_v19  ;;  %v41_v12 = vmul.f32 %v38_v55, %v800_v20  ;;  %v42_v16 = vmul.f32 %v38_v55, %v806_v23 }
  0x90   :  { %115 = vrot.lane.b32.xlu1 %v107_v33, %s702_s0  ;;  %139 = vrot.lane.b32.xlu0 %v133_v35, %s703_s9 }
  0x94   :  { %141 = vrot.lane.b32.xlu1 %v134_v36, %s703_s9  ;;  %143 = vrot.lane.b32.xlu0 %v135_v37, %s703_s9 }
  0x98   :  { %167 = vrot.lane.b32.xlu1 %v161_v39, %s704_s10  ;;  %169 = vrot.lane.b32.xlu0 %v162_v40, %s704_s10 }
  0x9c   :  { %171 = vrot.lane.b32.xlu1 %v163_v42, %s704_s10  ;;  %195 = vrot.lane.b32.xlu0 %v189_v43, %s705_s11 }
  0xa0   :  { %197 = vrot.lane.b32.xlu1 %v190_v44, %s705_s11  ;;  %199 = vrot.lane.b32.xlu0 %v191_v45, %s705_s11 }
  0xa4   :  { %223 = vrot.lane.b32.xlu1 %v217_v47, %s706_s12  ;;  %225 = vrot.lane.b32.xlu0 %v218_v48, %s706_s12 }
  0xa8   :  { %227 = vrot.lane.b32.xlu1 %v219_v50, %s706_s12  ;;  %251 = vrot.lane.b32.xlu0 %v245_v51, %s707_s13 }
  0xac   :  { %253 = vrot.lane.b32.xlu1 %v246_v52, %s707_s13  ;;  %255 = vrot.lane.b32.xlu0 %v247_v53, %s707_s13 }
  0xb0   :  { %283 = vrot.lane.b32.xlu1 %v790_v18, %s700_s25  ;;  %281 = vrot.lane.b32.xlu0 %v788_v17, %s700_s25 }
  0xf2   :  { %v56_v56 = vpop.permute.xlu1 %55  ;;  %v58_v57 = vpop.permute.xlu0 %57 }
  0xf3   :  { %v62_v9 = vsel %vm61_vm0, %v56_v56, %v58_v57  ;;  %v67_v10 = vadd.f32 %v56_v56, %v40_v8 }
  0xf4   :  { %v68_v24 = vadd.f32 %v62_v9, %v41_v12 }
  0xf6   :  { %v60_v58 = vpop.permute.xlu1 %59  ;;  %v84_v59 = vpop.permute.xlu0 %83 }
  0xf7   :  { %v63_v14 = vsel %vm61_vm0, %v58_v57, %v60_v58  ;;  %v95_v21 = vadd.f32 %v84_v59, %v67_v10 }
  0xf8   :  { %v69_v19 = vadd.f32 %v63_v14, %v42_v16 }
  0xfa   :  { %v86_v60 = vpop.permute.xlu1 %85  ;;  %v88_v61 = vpop.permute.xlu0 %87 }
  0xfb   :  { %v90_v22 = vsel %vm89_vm1, %v84_v59, %v86_v60  ;;  %v91_v25 = vsel %vm89_vm1, %v86_v60, %v88_v61 }
  0xfc   :  { %v96_v29 = vadd.f32 %v90_v22, %v68_v24  ;;  %v97_v32 = vadd.f32 %v91_v25, %v69_v19 }
  0xfe   :  { %v112_v62 = vpop.permute.xlu1 %111  ;;  %v114_v63 = vpop.permute.xlu0 %113 }
  0xff   :  { %v118_v26 = vsel %vm117_vm2, %v112_v62, %v114_v63  ;;  %v123_v27 = vadd.f32 %v112_v62, %v95_v21 }
 0x100   :  { %v124_v23 = vadd.f32 %v118_v26, %v96_v29 }
 0x102   :  { %v116_v0 = vpop.permute.xlu1 %115  ;;  %v140_v1 = vpop.permute.xlu0 %139 }
 0x103   :  { %v119_v30 = vsel %vm117_vm2, %v114_v63, %v116_v0  ;;  %v151_v33 = vadd.f32 %v140_v1, %v123_v27 }
 0x104   :  { %v125_v37 = vadd.f32 %v119_v30, %v97_v32 }
 0x106   :  { %v142_v2 = vpop.permute.xlu1 %141  ;;  %v144_v3 = vpop.permute.xlu0 %143 }
 0x107   :  { %v146_v34 = vsel %vm145_vm4, %v140_v1, %v142_v2  ;;  %v147_v35 = vsel %vm145_vm4, %v142_v2, %v144_v3 }
 0x108   :  { %v152_v41 = vadd.f32 %v146_v34, %v124_v23  ;;  %v153_v44 = vadd.f32 %v147_v35, %v125_v37 }
 0x10a   :  { %v168_v4 = vpop.permute.xlu1 %167  ;;  %v170_v5 = vpop.permute.xlu0 %169 }
 0x10b   :  { %v174_v20 = vsel %vm173_vm3, %v168_v4, %v170_v5 }
 0x10c   :  { %v179_v38 = vadd.f32 %v174_v20, %v151_v33 }
 0x10e   :  { %v172_v6 = vpop.permute.xlu1 %171  ;;  %v196_v7 = vpop.permute.xlu0 %195 }
 0x10f   :  { %v175_v39 = vsel %vm173_vm3, %v170_v5, %v172_v6  ;;  %v181_v48 = vadd.f32 %v172_v6, %v153_v44  ;;  %v352_v44 = vld [vmem:[%s946_s3] sm:$0xff] }
 0x110   :  { %v180_v47 = vadd.f32 %v175_v39, %v152_v41 }
 0x112   :  { %v198_v11 = vpop.permute.xlu1 %197  ;;  %v200_v15 = vpop.permute.xlu0 %199 }
 0x113   :  { %v202_v36 = vsel %vm201_vm5, %v196_v7, %v198_v11  ;;  %v203_v45 = vsel %vm201_vm5, %v198_v11, %v200_v15  ;;  %v209_v56 = vadd.f32 %v200_v15, %v181_v48 }
 0x114   :  { %v207_v46 = vadd.f32 %v202_v36, %v179_v38  ;;  %v208_v52 = vadd.f32 %v203_v45, %v180_v47  ;;  %v364_v38 = vld [vmem:[%s945_s4] sm:$0xff] }
 0x116   :  { %v224_v28 = vpop.permute.xlu1 %223  ;;  %v226_v31 = vpop.permute.xlu0 %225 }
 0x117   :  { %v230_v42 = vsel %vm229_vm6, %v224_v28, %v226_v31 }
 0x118   :  { %v235_v49 = vadd.f32 %v230_v42, %v207_v46 }
 0x11a   :  { %v228_v40 = vpop.permute.xlu1 %227  ;;  %v252_v43 = vpop.permute.xlu0 %251 }
 0x11b   :  { %v231_v50 = vsel %vm229_vm6, %v226_v31, %v228_v40  ;;  %v237_v60 = vadd.f32 %v228_v40, %v209_v56 }
 0x11c   :  { %v236_v59 = vadd.f32 %v231_v50, %v208_v52  ;;  %v708_v52 = vmov 0.0  }
 0x11d   :  { %463 = vmatprep.mubr.f32.mxu0 %v708_v52 }
 0x11e   :  { %v254_v51 = vpop.permute.xlu1 %253  ;;  %v256_v53 = vpop.permute.xlu0 %255 }
 0x11f   :  { %v258_v55 = vsel %vm257_vm7, %v252_v43, %v254_v51  ;;  %v259_v57 = vsel %vm257_vm7, %v254_v51, %v256_v53  ;;  %v265_v1 = vadd.f32 %v256_v53, %v237_v60  ;;  %v376_v53 = vld [vmem:[%s947_s5] sm:$0xff] }
 0x120   :  { %v263_v58 = vadd.f32 %v258_v55, %v235_v49  ;;  %v264_v63 = vadd.f32 %v259_v57, %v236_v59  ;;  %680 = vmatprep.mubr.msk.f32.mxu1 %vm392_vm9, %v376_v53 }
 0x122   :  { %v284_v61 = vpop.permute.xlu1 %283  ;;  %v290_v62 = vmul.f32 %v841_v54, %v263_v58  ;;  %v282_v0 = vpop.permute.xlu0 %281 }
 0x123   :  { %v285_v2 = vsel %vm61_vm0, %v841_v54, %v282_v0  ;;  %v286_v3 = vsel %vm61_vm0, %v282_v0, %v284_v61 }
 0x124   :  { %296 = vrot.lane.b32.xlu0 %v290_v62, %s707_s13  ;;  %v291_v4 = vmul.f32 %v285_v2, %v264_v63  ;;  %v292_v5 = vmul.f32 %v286_v3, %v265_v1 }
 0x126   :  { %298 = vrot.lane.b32.xlu1 %v291_v4, %s707_s13 }
 0x128   :  { %300 = vrot.lane.b32.xlu0 %v292_v5, %s707_s13 }
 0x196   :  { %v297_v6 = vpop.permute.xlu0 %296 }
 0x198   :  { %v299_v7 = vpop.permute.xlu1 %298 }
 0x199   :  { %v302_v9 = vsel %vm257_vm7, %v297_v6, %v299_v7 }
 0x19a   :  { %v301_v8 = vpop.permute.xlu0 %300 }
 0x19b   :  { %v303_v10 = vsel %vm257_vm7, %v299_v7, %v301_v8  ;;  %v309_v12 = vsel %vm308_vm8, %v301_v8, 0.0 }
 0x19c   :  { %v307_v11 = vadd.f32 %v303_v10, %v302_v9 }
 0x19e   :  { %v310_v14 = vadd.f32 %v309_v12, %v307_v11 }
 0x1a0   :  { %311 = vadd.xlane.f32.xlu1 %v310_v14 }
 0x229   :  { %v312_v15 = vpop.xlane.xlu1 %311 }
 0x22a   :  { %v313_v16 = vrot.slane %v312_v15, 4 }
 0x22c   :  { %v314_v21 = vadd.f32 %v313_v16, %v312_v15 }
 0x22e   :  { %v315_v22 = vmul.f32 0.001953125, %v314_v21 }
 0x230   :  { %318 = vperm.xlu0 %693, %v315_v22  }
 0x2ab   :  { %v319_v24 = vpop.permute.xlu0 %318 }
 0x2ac   :  { %v321_v25 = vsub.f32 %v263_v58, %v319_v24  ;;  %v322_v19 = vsub.f32 %v264_v63, %v319_v24  ;;  %v323_v27 = vsub.f32 %v265_v1, %v319_v24  ;;  %v377_v63 = vld [vmem:[%s947_s5 + $0x8] sm:$0xff] }
 0x2ae   :  { %v324_v26 = vmul.f32 %v321_v25, %v841_v54  ;;  %v325_v28 = vmul.f32 %v322_v19, %v285_v2  ;;  %v326_v30 = vmul.f32 %v323_v27, %v286_v3 }
 0x2b0   :  { %v327_v29 = vmul.f32 %v324_v26, %v324_v26  ;;  %v328_v20 = vmul.f32 %v325_v28, %v325_v28  ;;  %v329_v31 = vmul.f32 %v326_v30, %v326_v30 }
 0x2b2   :  { %333 = vrot.lane.b32.xlu0 %v327_v29, %s707_s13 }
 0x2b6   :  { %335 = vrot.lane.b32.xlu0 %v328_v20, %s707_s13 }
 0x2ba   :  { %337 = vrot.lane.b32.xlu0 %v329_v31, %s707_s13 }
 0x324   :  { %v334_v32 = vpop.permute.xlu0 %333 }
 0x328   :  { %v336_v33 = vpop.permute.xlu0 %335 }
 0x329   :  { %v339_v23 = vsel %vm257_vm7, %v334_v32, %v336_v33 }
 0x32c   :  { %v338_v34 = vpop.permute.xlu0 %337 }
 0x32d   :  { %v340_v35 = vsel %vm257_vm7, %v336_v33, %v338_v34  ;;  %v345_v36 = vsel %vm308_vm8, %v338_v34, 0.0 }
 0x32e   :  { %v344_v54 = vadd.f32 %v340_v35, %v339_v23 }
 0x330   :  { %v346_v37 = vadd.f32 %v345_v36, %v344_v54 }
 0x332   :  { %347 = vadd.xlane.f32.xlu0 %v346_v37 }
 0x348   :  { %367 = vperm.xlu0 %693, %v364_v38  }
 0x3bb   :  { %v348_v39 = vpop.xlane.xlu0 %347 }
 0x3bc   :  { %v349_v40 = vrot.slane %v348_v39, 4 }
 0x3be   :  { %v350_v41 = vadd.f32 %v349_v40, %v348_v39 }
 0x3c0   :  { %v351_v42 = vmul.f32 0.001953125, %v350_v41 }
 0x3c2   :  { %v353_v43 = vadd.f32 1e-05, %v351_v42 }
 0x3c3   :  { %v368_v50 = vpop.permute.xlu0 %367 }
 0x3c4   :  { %695 = vrsqrt.f32 %v353_v43 }
 0x3d1   :  { %v696_v45 = vpop.eup %695 }
 0x3d2   :  { %v355_v46 = vmul.f32 %v696_v45, %v352_v44 }
 0x3d4   :  { %358 = vperm.xlu1 %694, %v355_v46  }
 0x44f   :  { %v359_v47 = vpop.permute.xlu1 %358 }
 0x450   :  { %v362_v48 = vmul.f32 %v359_v47, %v325_v28  ;;  %v363_v49 = vmul.f32 %v359_v47, %v326_v30  ;;  %v361_v55 = vmul.f32 %v359_v47, %v324_v26  ;;  %v629_v30 = vld [vmem:[%s948_s7] sm:$0xff] }
 0x452   :  { %v371_v51 = vadd.f32 %v368_v50, %v362_v48  ;;  %v372_v57 = vadd.f32 %v368_v50, %v363_v49  ;;  %v370_v59 = vadd.f32 %v368_v50, %v361_v55 }
 0x454   :  { %v374_v56 = vmax.f32 %v371_v51, 0.0  ;;  %v375_v58 = vmax.f32 %v372_v57, 0.0  ;;  %v373_v60 = vmax.f32 %v370_v59, 0.0  ;;  %v607_v57 = vld [vmem:[%s949_s6] sm:$0xff] }
 0x456   :  { %383 = vrot.lane.b32.xlu1 %v374_v56, %s707_s13  ;;  %v608_v56 = vld [vmem:[%s949_s6 + $0x8] sm:$0xff] }
 0x45a   :  { %385 = vrot.lane.b32.xlu1 %v375_v58, %s707_s13 }
 0x45e   :  { %381 = vrot.lane.b32.xlu1 %v373_v60, %s707_s13 }
 0x4c8   :  { %v384_v61 = vpop.permute.xlu1 %383 }
 0x4cc   :  { %v386_v62 = vpop.permute.xlu1 %385 }
 0x4cd   :  { %678 = vmatprep.subr.mxu1 %v386_v62  ;;  %v388_v0 = vsel %vm257_vm7, %v384_v61, %v386_v62 }
 0x4ce   :  { %429 = vmatprep.subr.mxu0 %v388_v0  ;;  %679 = vmatpush3.msra.mxu1 %v386_v62 }
 0x4cf   :  { %681 = vmatmul.mubr.msk.f32.vlgmr.msra.gmra.mxu1 %vm392_vm9, %v377_v63 }
 0x4d0   :  { %v382_v1 = vpop.permute.xlu1 %381 }
 0x4d1   :  { %v387_v2 = vsel %vm257_vm7, %v382_v1, %v384_v61  ;;  %v630_v61 = vld [vmem:[%s948_s7 + $0x8] sm:$0xff] }
 0x4d2   :  { %430 = vmatpush1.msra.mxu0 %v387_v2 }
 0x4d3   :  { %671 = vmatmul.mubr.msk.f32.vlgmr.msra.gmra.mxu0 %vm392_vm9, %v376_v53 }
 0x4d4   :  { %469 = vmatprep.mubr.f32.mxu0 %v708_v52 }
 0x4d7   :  { %672 = vmatmul.mubr.msk.f32.gmra.mxu0 %vm392_vm9, %v377_v63 }
 0x58f   :  { %v682_v3 = vpop.f32.mrf.mxu1 }
 0x590   :  { %v559_v14 = vmul.f32 %v682_v3, %v790_v18 }
 0x591   :  { %v542_v4 = vpop.f32.mrf.mxu1 }
 0x592   :  { %v556_v6 = vmul.f32 %v542_v4, %v790_v18  ;;  %v566_v25 = vsel %vm308_vm8, %v559_v14, 0.0 }
 0x593   :  { %v465_v5 = vpop.f32.mrf.mxu0 }
 0x594   :  { %v554_v8 = vmul.f32 %v465_v5, %v781_v13  ;;  %v561_v11 = vsel %vm308_vm8, %v556_v6, 0.0 }
 0x595   :  { %v467_v7 = vpop.f32.mrf.mxu0 }
 0x596   :  { %v555_v9 = vmul.f32 %v467_v7, %v788_v17 }
 0x597   :  { %v471_v10 = vpop.f32.mrf.mxu0 }
 0x598   :  { %v560_v12 = vadd.f32 %v555_v9, %v554_v8  ;;  %v557_v16 = vmul.f32 %v471_v10, %v781_v13 }
 0x599   :  { %v473_v15 = vpop.f32.mrf.mxu0 }
 0x59a   :  { %v558_v21 = vmul.f32 %v473_v15, %v788_v17  ;;  %v562_v22 = vadd.f32 %v561_v11, %v560_v12 }
 0x59c   :  { %v565_v24 = vadd.f32 %v558_v21, %v557_v16  ;;  %563 = vadd.xlane.f32.xlu1 %v562_v22 }
 0x59e   :  { %v567_v19 = vadd.f32 %v566_v25, %v565_v24 }
 0x5a0   :  { %568 = vadd.xlane.f32.xlu0 %v567_v19 }
 0x625   :  { %v564_v26 = vpop.xlane.xlu1 %563 }
 0x629   :  { %v569_v27 = vpop.xlane.xlu0 %568 }
 0x62a   :  { %v570_v28 = vadd.f32 %v569_v27, %v564_v26 }
 0x62c   :  { %v571_v29 = vmul.f32 0.001953125, %v570_v28 }
 0x62e   :  { %574 = vperm.xlu1 %694, %v571_v29  }
 0x632   :  { %633 = vperm.xlu1 %694, %v629_v30  }
 0x6a9   :  { %v575_v20 = vpop.permute.xlu1 %574 }
 0x6aa   :  { %v577_v31 = vsub.f32 %v465_v5, %v575_v20  ;;  %v578_v32 = vsub.f32 %v467_v7, %v575_v20  ;;  %v579_v33 = vsub.f32 %v542_v4, %v575_v20  ;;  %v580_v34 = vsub.f32 %v471_v10, %v575_v20 }
 0x6ab   :  { %v581_v23 = vsub.f32 %v473_v15, %v575_v20  ;;  %v582_v35 = vsub.f32 %v682_v3, %v575_v20 }
 0x6ac   :  { %v583_v54 = vmul.f32 %v577_v31, %v781_v13  ;;  %v584_v36 = vmul.f32 %v578_v32, %v788_v17  ;;  %v585_v37 = vmul.f32 %v579_v33, %v790_v18  ;;  %v586_v38 = vmul.f32 %v580_v34, %v781_v13 }
 0x6ad   :  { %v587_v39 = vmul.f32 %v581_v23, %v788_v17  ;;  %v588_v40 = vmul.f32 %v582_v35, %v790_v18  ;;  %v634_v62 = vpop.permute.xlu1 %633 }
 0x6ae   :  { %v589_v41 = vmul.f32 %v583_v54, %v583_v54  ;;  %v590_v42 = vmul.f32 %v584_v36, %v584_v36  ;;  %v591_v43 = vmul.f32 %v585_v37, %v585_v37  ;;  %v592_v44 = vmul.f32 %v586_v38, %v586_v38 }
 0x6af   :  { %v593_v45 = vmul.f32 %v587_v39, %v587_v39  ;;  %v594_v46 = vmul.f32 %v588_v40, %v588_v40 }
 0x6b0   :  { %v595_v47 = vadd.f32 %v590_v42, %v589_v41  ;;  %v596_v48 = vsel %vm308_vm8, %v591_v43, 0.0 }
 0x6b1   :  { %v600_v50 = vadd.f32 %v593_v45, %v592_v44  ;;  %v601_v51 = vsel %vm308_vm8, %v594_v46, 0.0 }
 0x6b2   :  { %v597_v49 = vadd.f32 %v596_v48, %v595_v47 }
 0x6b3   :  { %v602_v52 = vadd.f32 %v601_v51, %v600_v50 }
 0x6b4   :  { %598 = vadd.xlane.f32.xlu0 %v597_v49 }
 0x6b8   :  { %603 = vadd.xlane.f32.xlu0 %v602_v52 }
 0x73d   :  { %v599_v13 = vpop.xlane.xlu0 %598 }
 0x741   :  { %v604_v17 = vpop.xlane.xlu0 %603 }
 0x742   :  { %v605_v53 = vadd.f32 %v604_v17, %v599_v13 }
 0x744   :  { %v606_v18 = vmul.f32 0.001953125, %v605_v53 }
 0x746   :  { %v609_v55 = vadd.f32 1e-05, %v606_v18 }
 0x748   :  { %697 = vrsqrt.f32 %v609_v55 }
 0x755   :  { %v698_v58 = vpop.eup %697 }
 0x756   :  { %v612_v59 = vmul.f32 %v698_v58, %v608_v56  ;;  %v611_v60 = vmul.f32 %v698_v58, %v607_v57 }
 0x758   :  { %620 = vperm.xlu1 %694, %v612_v59   ;;  %615 = vperm.xlu0 %693, %v611_v60  }
 0x75c   :  { %638 = vperm.xlu1 %694, %v630_v61  }
 0x7d3   :  { %v616_v63 = vpop.permute.xlu0 %615  ;;  %v621_v0 = vpop.permute.xlu1 %620 }
 0x7d4   :  { %v623_v1 = vmul.f32 %v616_v63, %v583_v54  ;;  %v624_v2 = vmul.f32 %v616_v63, %v584_v36  ;;  %v625_v3 = vmul.f32 %v616_v63, %v585_v37  ;;  %v626_v7 = vmul.f32 %v621_v0, %v586_v38 }
 0x7d5   :  { %v627_v8 = vmul.f32 %v621_v0, %v587_v39  ;;  %v628_v9 = vmul.f32 %v621_v0, %v588_v40 }
 0x7d6   :  { %v641_v4 = vadd.f32 %v634_v62, %v623_v1  ;;  %v642_v5 = vadd.f32 %v634_v62, %v624_v2  ;;  %v643_v6 = vadd.f32 %v634_v62, %v625_v3 }
 0x7d7   :  { %v639_v10 = vpop.permute.xlu1 %638 }
 0x7d8   :  { %v647_v11 = vmax.f32 %v641_v4, 0.0  ;;  %v648_v12 = vmax.f32 %v642_v5, 0.0  ;;  %v649_v14 = vmax.f32 %v643_v6, 0.0  ;;  %v644_v15 = vadd.f32 %v639_v10, %v626_v7 }
 0x7d9   :  { %v645_v16 = vadd.f32 %v639_v10, %v627_v8  ;;  %v646_v21 = vadd.f32 %v639_v10, %v628_v9 }
 0x7da   :  { %653 = vst [vmem:[%s950_s8] sm:$0xff] %v647_v11  ;;  %654 = vst [vmem:[%s950_s8 + $0x8] sm:$0xff] %v648_v12  ;;  %v650_v22 = vmax.f32 %v644_v15, 0.0 }
 0x7db   :  { %655 = vst.msk [vmem:[%s950_s8 + $0x10] sm:$0xff] %vm308_vm8, %v649_v14  ;;  %v651_v24 = vmax.f32 %v645_v16, 0.0  ;;  %v652_v25 = vmax.f32 %v646_v21, 0.0 }
 0x7dc   :  { %656 = vst [vmem:[%s950_s8 + $0x18] sm:$0xff] %v650_v22 }
 0x7dd   :  { %657 = vst [vmem:[%s950_s8 + $0x20] sm:$0xff] %v651_v24  ;;  %658 = vst.msk [vmem:[%s950_s8 + $0x28] sm:$0xff] %vm308_vm8, %v652_v25 }

</bundles_post_ra>
